<compile_context>
chip_gen: v7x
topology: tpu7x:2x2x1
jax: 0.10.0
libtpu: 0.0.40
codegen_flags: <defaults>
</compile_context>

<pallas_src>
import functools

import jax
import jax.numpy as jnp
from jax import lax
from jax.experimental import pallas as pl
from jax.experimental.pallas import tpu as pltpu


def _conv_stats_kernel(p_ref, w_ref, y_ref, s_ref):
    """Pass 1: one bf16 MXU matmul per tile + per-tile partial BN sums.

    p_ref: [KKCp, TS]  bf16 patches (channel-of-patch major, lane-dense along TS)
    w_ref: [Cpad, KKCp] bf16 weights (resident, tiny)
    y_ref: [Cpad, TS]  bf16 conv output tile (lane-dense store)
    s_ref: [Cpad, 2]   f32 partial (sum, sum-of-squares) for this grid step
    """
    acc = jnp.dot(w_ref[...], p_ref[...], preferred_element_type=jnp.float32)  # [Cpad, TS] f32
    y_ref[...] = acc.astype(y_ref.dtype)
    s_ref[:, 0:1] = jnp.sum(acc, axis=1, keepdims=True)
    s_ref[:, 1:2] = jnp.sum(acc * acc, axis=1, keepdims=True)


def _bn_kernel(y_ref, s_ref, g_ref, b_ref, o_ref, *, inv_m, eps, cout):
    """Pass 2: normalize + affine as a single per-element FMA, channel-major output."""
    mean = s_ref[:, 0:1] * inv_m                                   # [Cpad, 1]
    # Biased (training-mode) variance via E[y^2] - mean^2, reduced from per-tile f32 partials.
    var = s_ref[:, 1:2] * inv_m - mean * mean
    scale = g_ref[...] * lax.rsqrt(var + eps)                      # rsqrt -> EUP (free slot)
    shift = b_ref[...] - mean * scale
    z = y_ref[...].astype(jnp.float32) * scale + shift             # [Cpad, TS] f32 FMA
    o_ref[...] = z[:cout, :]                                       # NCHW tile, lane-dense store


def conv_bn(x_nchw, weight_oihw, bias, gamma, beta, *, stride=1, padding=0, eps=1e-5):
    """Forward of ConvBn. x_nchw: [N, Cin, H, W]; weight: [Cout, Cin, K, K]. Returns NCHW f32."""
    del bias  # conv bias is exactly cancelled by batch-stat BN mean subtraction.

    N, Cin, H, W = x_nchw.shape
    Cout, _, K, _ = weight_oihw.shape
    OH = (H + 2 * padding - K) // stride + 1
    OW = (W + 2 * padding - K) // stride + 1
    OHW = OH * OW
    M = N * OHW                                                    # true element count for stats
    Cpad = ((Cout + 127) // 128) * 128                             # lane-dense output channels
    KKC = K * K * Cin
    KKCp = ((KKC + 7) // 8) * 8                                    # sublane-align contraction dim

    # Spatial tile: 256-512 rows per MXU call; multiple of 128 (or full extent) for lane-dense
    # stores. v6e's 128 MiB VMEM would allow larger TS; keep a v7x-safe (64 MiB) default.
    if OHW <= 512:
        TS, nb = OHW, 1
    else:
        TS = 512
        nb = -(-OHW // TS)
    OHWp = nb * TS                                                 # zero-padded spatial extent

    # ---- wrapper glue: layout only (bf16 cast, spatial pad, channel-major im2col) -----------
    xb = x_nchw.astype(jnp.bfloat16)
    if padding:
        xb = jnp.pad(xb, ((0, 0), (0, 0), (padding, padding), (padding, padding)))
    pats = []
    for i in range(K):
        for j in range(K):
            pats.append(xb[:, :, i:i + (OH - 1) * stride + 1:stride,
                               j:j + (OW - 1) * stride + 1:stride])        # [N, Cin, OH, OW]
    if KKCp > KKC:
        pats.append(jnp.zeros((N, KKCp - KKC, OH, OW), jnp.bfloat16))
    pat = jnp.concatenate(pats, axis=1).reshape(N, KKCp, OHW)              # [N, KKCp, OHW] bf16
    if OHWp > OHW:
        pat = jnp.pad(pat, ((0, 0), (0, 0), (0, OHWp - OHW)))              # zero rows -> zero y

    # Weights: OIHW -> [K, K, Cin, Cout] -> [KKC, Cout] (row order matches patch concat),
    # pad to [KKCp, Cpad], transpose to [Cpad, KKCp], bf16 for the MXU.
    w_flat = jnp.transpose(weight_oihw, (2, 3, 1, 0)).reshape(KKC, Cout)
    w_flat = jnp.pad(w_flat, ((0, KKCp - KKC), (0, Cpad - Cout)))
    w2t = jnp.transpose(w_flat).astype(jnp.bfloat16)                       # [Cpad, KKCp]

    g2 = jnp.pad(gamma.astype(jnp.float32), (0, Cpad - Cout)).reshape(Cpad, 1)
    b2 = jnp.pad(beta.astype(jnp.float32), (0, Cpad - Cout)).reshape(Cpad, 1)

    # ---- pass 1: conv matmul + per-tile partial BN stats (fully parallel grid) ---------------
    y_int, partials = pl.pallas_call(
        _conv_stats_kernel,
        grid=(N, nb),
        in_specs=[
            pl.BlockSpec((None, KKCp, TS), lambda n, s: (n, 0, s)),
            pl.BlockSpec((Cpad, KKCp), lambda n, s: (0, 0)),
        ],
        out_specs=[
            pl.BlockSpec((None, Cpad, TS), lambda n, s: (n, 0, s)),
            pl.BlockSpec((None, None, Cpad, 2), lambda n, s: (n, s, 0, 0)),
        ],
        out_shape=[
            jax.ShapeDtypeStruct((N, Cpad, OHWp), jnp.bfloat16),           # channel-major y
            jax.ShapeDtypeStruct((N, nb, Cpad, 2), jnp.float32),           # per-tile partial stats
        ],
        compiler_params=pltpu.CompilerParams(
            dimension_semantics=("parallel", "parallel")),
    )(pat, w2t)

    # Tiny partial-sum reduction (G x Cpad x 2 floats) in the wrapper.
    stats = jnp.sum(partials, axis=(0, 1))                                 # [Cpad, 2] f32

    # ---- pass 2: normalize + affine, writes NCHW directly (no XLA epilogue) ------------------
    out3 = pl.pallas_call(
        functools.partial(_bn_kernel, inv_m=1.0 / float(M), eps=eps, cout=Cout),
        grid=(N, nb),
        in_specs=[
            pl.BlockSpec((None, Cpad, TS), lambda n, s: (n, 0, s)),
            pl.BlockSpec((Cpad, 2), lambda n, s: (0, 0)),
            pl.BlockSpec((Cpad, 1), lambda n, s: (0, 0)),
            pl.BlockSpec((Cpad, 1), lambda n, s: (0, 0)),
        ],
        out_specs=pl.BlockSpec((None, Cout, TS), lambda n, s: (n, 0, s)),
        out_shape=jax.ShapeDtypeStruct((N, Cout, OHW), jnp.float32),
        compiler_params=pltpu.CompilerParams(
            dimension_semantics=("parallel", "parallel")),
    )(y_int, stats, g2, b2)

    return out3.reshape(N, Cout, OH, OW)                                   # free row-major reshape


def _reference(x, w, b, gamma, beta, *, stride, padding, eps):
    y = lax.conv_general_dilated(
        x.astype(jnp.float32), w.astype(jnp.float32),
        window_strides=(stride, stride),
        padding=[(padding, padding), (padding, padding)],
        dimension_numbers=("NCHW", "OIHW", "NCHW"),
    ) + b.reshape(1, -1, 1, 1)
    mean = jnp.mean(y, axis=(0, 2, 3), keepdims=True)
    var = jnp.mean((y - mean) ** 2, axis=(0, 2, 3), keepdims=True)
    return (y - mean) / jnp.sqrt(var + eps) * gamma.reshape(1, -1, 1, 1) + beta.reshape(1, -1, 1, 1)


if __name__ == "__main__":
    # ConvBn(in_chans=4, out_channels=8, kernel_size=3, stride=1, padding=1)
    N, Cin, H, W = 2, 4, 16, 16
    Cout, K, stride, padding, eps = 8, 3, 1, 1, 1e-5

    key = jax.random.PRNGKey(0)
    kx, kw, kb, kg, kbe = jax.random.split(key, 5)
    x = jax.random.normal(kx, (N, Cin, H, W), dtype=jnp.float32)
    weight = jax.random.normal(kw, (Cout, Cin, K, K), dtype=jnp.float32) * 0.1
    bias = jax.random.normal(kb, (Cout,), dtype=jnp.float32) * 0.1
    gamma = 1.0 + 0.1 * jax.random.normal(kg, (Cout,), dtype=jnp.float32)
    beta = 0.1 * jax.random.normal(kbe, (Cout,), dtype=jnp.float32)

    out = conv_bn(x, weight, bias, gamma, beta, stride=stride, padding=padding, eps=eps)
    out = jax.block_until_ready(out)

    ref = _reference(x, weight, bias, gamma, beta, stride=stride, padding=padding, eps=eps)
    assert out.shape == (N, Cout, H, W)
    # bf16 MXU operands + bf16 intermediate y -> loose-but-comfortable tolerance.
    assert jnp.allclose(out, ref, rtol=2e-2, atol=2e-2), "mismatch vs JAX reference"

    print("KERNEL_OK")
</pallas_src>

<mosaic_0001>
module attributes {stable_mosaic.version = 11 : i64} {
  func.func @_conv_stats_kernel(%arg0: i32, %arg1: i32, %arg2: memref<1x40x256xbf16, #tpu.memory_space<vmem>>, %arg3: memref<128x40xbf16, #tpu.memory_space<vmem>>, %arg4: memref<1x128x256xbf16, #tpu.memory_space<vmem>>, %arg5: memref<1x1x128x2xf32, #tpu.memory_space<vmem>>) attributes {dimension_semantics = [#tpu.dimension_semantics<parallel>, #tpu.dimension_semantics<parallel>], iteration_bounds = array<i64: 2, 1>, scalar_prefetch = 0 : i64, scratch_operands = 0 : i64, tpu.core_type = #tpu.core_type<tc>, window_params = [{transform_indices = @transform_0, window_bounds = array<i64: 1, 40, 256>}, {pipeline_mode = #tpu.pipeline_mode<synchronous>, transform_indices = @transform_1, window_bounds = array<i64: 128, 40>}, {transform_indices = @transform_2, window_bounds = array<i64: 1, 128, 256>}, {transform_indices = @transform_3, window_bounds = array<i64: 1, 1, 128, 2>}]} {
    %c0 = arith.constant 0 : index
    %c0_0 = arith.constant 0 : index
    %0 = vector.load %arg3[%c0, %c0_0] : memref<128x40xbf16, #tpu.memory_space<vmem>>, vector<128x40xbf16>
    %c0_1 = arith.constant 0 : index
    %c0_2 = arith.constant 0 : index
    %c0_3 = arith.constant 0 : index
    %1 = vector.load %arg2[%c0_1, %c0_2, %c0_3] : memref<1x40x256xbf16, #tpu.memory_space<vmem>>, vector<1x40x256xbf16>
    %2 = vector.shape_cast %1 : vector<1x40x256xbf16> to vector<40x256xbf16>
    %cst = arith.constant dense<0.000000e+00> : vector<128x256xf32>
    %3 = tpu.matmul %0, %2, %cst {dimension_numbers = #tpu.dot_dimension_numbers<[1], [0], [0], [1], [0, 0, 1, 1], [], []>} : vector<128x40xbf16>, vector<40x256xbf16>, vector<128x256xf32> -> vector<128x256xf32>
    %4 = arith.truncf %3 : vector<128x256xf32> to vector<128x256xbf16>
    %c0_4 = arith.constant 0 : index
    %c0_5 = arith.constant 0 : index
    %c0_6 = arith.constant 0 : index
    %5 = vector.load %arg4[%c0_4, %c0_5, %c0_6] : memref<1x128x256xbf16, #tpu.memory_space<vmem>>, vector<1x128x256xbf16>
    %6 = vector.shape_cast %5 : vector<1x128x256xbf16> to vector<128x256xbf16>
    %7 = vector.shape_cast %4 : vector<128x256xbf16> to vector<1x128x256xbf16>
    tpu.vector_store %arg4[%c0_4, %c0_5, %c0_6], %7 {strides = array<i32>} : memref<1x128x256xbf16, #tpu.memory_space<vmem>>, vector<1x128x256xbf16>,
    %cst_7 = arith.constant dense<0.000000e+00> : vector<128xf32>
    %8 = vector.multi_reduction <add>, %3, %cst_7 [1] : vector<128x256xf32> to vector<128xf32>
    %9 = vector.shape_cast %8 : vector<128xf32> to vector<128x1xf32>
    %c0_8 = arith.constant 0 : index
    %c0_9 = arith.constant 0 : index
    %c0_10 = arith.constant 0 : index
    %c0_11 = arith.constant 0 : index
    %10 = vector.load %arg5[%c0_8, %c0_9, %c0_10, %c0_11] : memref<1x1x128x2xf32, #tpu.memory_space<vmem>>, vector<1x1x128x1xf32>
    %11 = vector.shape_cast %10 : vector<1x1x128x1xf32> to vector<128x1xf32>
    %12 = vector.shape_cast %9 : vector<128x1xf32> to vector<1x1x128x1xf32>
    tpu.vector_store %arg5[%c0_8, %c0_9, %c0_10, %c0_11], %12 {strides = array<i32>} : memref<1x1x128x2xf32, #tpu.memory_space<vmem>>, vector<1x1x128x1xf32>,
    %13 = arith.mulf %3, %3 : vector<128x256xf32>
    %cst_12 = arith.constant dense<0.000000e+00> : vector<128xf32>
    %14 = vector.multi_reduction <add>, %13, %cst_12 [1] : vector<128x256xf32> to vector<128xf32>
    %15 = vector.shape_cast %14 : vector<128xf32> to vector<128x1xf32>
    %c0_13 = arith.constant 0 : index
    %c0_14 = arith.constant 0 : index
    %c0_15 = arith.constant 0 : index
    %c1 = arith.constant 1 : index
    %16 = vector.load %arg5[%c0_13, %c0_14, %c0_15, %c1] : memref<1x1x128x2xf32, #tpu.memory_space<vmem>>, vector<1x1x128x1xf32>
    %17 = vector.shape_cast %16 : vector<1x1x128x1xf32> to vector<128x1xf32>
    %18 = vector.shape_cast %15 : vector<128x1xf32> to vector<1x1x128x1xf32>
    tpu.vector_store %arg5[%c0_13, %c0_14, %c0_15, %c1], %18 {strides = array<i32>} : memref<1x1x128x2xf32, #tpu.memory_space<vmem>>, vector<1x1x128x1xf32>,
    return
  }
  func.func @transform_0(%arg0: i32, %arg1: i32) -> (i32, i32, i32) {
    %c0_i32 = arith.constant 0 : i32
    %c0_i32_0 = arith.constant 0 : i32
    return %arg0, %c0_i32, %arg1 : i32, i32, i32
  }
  func.func @transform_1(%arg0: i32, %arg1: i32) -> (i32, i32) {
    %c0_i32 = arith.constant 0 : i32
    %c0_i32_0 = arith.constant 0 : i32
    %c0_i32_1 = arith.constant 0 : i32
    return %c0_i32, %c0_i32_0 : i32, i32
  }
  func.func @transform_2(%arg0: i32, %arg1: i32) -> (i32, i32, i32) {
    %c0_i32 = arith.constant 0 : i32
    %c0_i32_0 = arith.constant 0 : i32
    return %arg0, %c0_i32, %arg1 : i32, i32, i32
  }
  func.func @transform_3(%arg0: i32, %arg1: i32) -> (i32, i32, i32, i32) {
    %c0_i32 = arith.constant 0 : i32
    %c0_i32_0 = arith.constant 0 : i32
    %c0_i32_1 = arith.constant 0 : i32
    return %arg0, %arg1, %c0_i32, %c0_i32_0 : i32, i32, i32, i32
  }
}

</mosaic_0001>

<bundles_post_ra>
// kernel: tpu_custom_call.1
= control target key start
LH: loop header
LB: loop body
LE: loop exit
PB: predicated region body
PF: predicated region fallthrough
CT: control target
= control target key end

     0   :  { %9 = vsyncpa [#allocation3], 0  ;;  %s1388_s0 = inlined_call_operand.vmem [shape: bf16[2,40,256], index: 0, kind: input, shape index: {}]   ;;  %s1389_s1 = inlined_call_operand.vmem [shape: bf16[128,40], index: 1, kind: input, shape index: {}]   ;;  %s1390_s2 = inlined_call_operand.hbm [shape: bf16[2,128,256], index: 2, kind: output, shape index: {0}]   ;;  %s1391_s3 = inlined_call_operand.vmem [shape: f32[2,1,128,2], index: 3, kind: output, shape index: {1}]  }
   0x1   :  { %11 = vsyncpa [#allocation3 + $0x1], 0  ;;  %s1133_s12 = smov 0   ;;  %s1135_s13 = smov 0  }
   0x2   :  { %s1137_s14 = smov 0   ;;  %s1139_s15 = smov 0  }
   0x3   :  { %s1141_s16 = smov 0   ;;  %s1143_s17 = smov 0  }
   0x4 LB: > { %s877_s18 = sadd.s32 4294967295, %s1107_s17   ;;  %s878_s19 = sadd.s32 4294967294, %s1107_s17   ;;  %s1107_s17 = sphi %s1143_s17, %s17_s17   ;;  %s1103_s16 = sphi %s1141_s16, %s1398_s16   ;;  %s1099_s15 = sphi %s1139_s15, %s1397_s15   ;;  %s1095_s14 = sphi %s1137_s14, %s1396_s14   ;;  %s1091_s13 = sphi %s1135_s13, %s1395_s13   ;;  %s1087_s12 = sphi %s1133_s12, %s1394_s12  }
   0x5   : > { %s29_s20 = sadd.s32 1, %s1103_s16  ;;  %s87_s21 = sadd.s32 1, %s1095_s14 }
   0x6   : > { %p31_p0 = scmp.ge.s32.totalorder %s29_s20, 2  ;;  %p97_p1 = scmp.ne.s32.totalorder %s1095_s14, %s1091_s13 }
   0x7   : > { %p98_p2 = scmp.eq.s32.totalorder %s877_s18, 1  ;;  %p103_p3 = scmp.ne.s32.totalorder %s1091_s13, %s1087_s12 }
   0x8   : > { %s1400_s20 = smov (%p31_p0, %s29_s20), 0  ;;  %p104_p5 = scmp.eq.s32.totalorder %s878_s19, 1 }
   0x9   : > { %p1173_p4 = por %p98_p2, %p97_p1  ;;  %s82_s23 = ssub.s32 %s1103_s16, %s1400_s20 }
   0xa   : > { %p881_p6 = scmp.ge.s32.totalorder %s1107_s17, 1  ;;  %p85_p7 = scmp.eq.s32.totalorder %s82_s23, 0 }
   0xb   : > { %p1180_p8 = por %p104_p5, %p103_p3  ;;  %p166_p9 = scmp.lt.s32.totalorder %s1107_s17, 3 }
   0xc   : > { %s1186_s25 = scalar_select %p85_p7, %s1095_s14, %s87_s21  }
   0xd   : > { %p167_p10 = pnand %p881_p6, %p166_p9 }
   0xe   : > { %p204_p11 = scmp.lt.s32.totalorder (!%p167_p10), %s1099_s15, 1  ;;  %v1109_v0 = vmov (!%p167_p10), 0   ;;  %vm335_vm0 = vcmask (!%p167_p10), 1043456   ;;  %v1021_v9 = vld [vmem:[%s1389_s1] sm:$0xff] (!%p167_p10)   ;;  %vm310_vm1 = vcmask (!%p167_p10), 326656   ;;  %v1023_v11 = vld [vmem:[%s1389_s1 + $0x8] sm:$0xff] (!%p167_p10)  }
   0xf   : > { %170 = sbr.rel (%p167_p10) target bundleno = 460 (0x1cc), region = 28  ;;  %374 = vmatprep.mubr.bf16.mxu0 (!%p167_p10), %v1109_v0  ;;  %414 = vmatprep.mubr.bf16.mxu1 (!%p167_p10), %v1109_v0  ;;  %v1022_v10 = vld [vmem:[%s1389_s1 + $0x20] sm:$0xff] (!%p167_p10)   ;;  %v1024_v12 = vld [vmem:[%s1389_s1 + $0x28] sm:$0xff] (!%p167_p10)   ;;  %v1025_v13 = vld [vmem:[%s1389_s1 + $0x10] sm:$0xff] (!%p167_p10)   ;;  %s189_s4 = sand.u32 (!%p167_p10), 1, %s1091_s13  }
  0x10   : > { %v1026_v14 = vld [vmem:[%s1389_s1 + $0x30] sm:$0xff] (!%p167_p10)   ;;  %v1027_v15 = vld [vmem:[%s1389_s1 + $0x18] sm:$0xff] (!%p167_p10)   ;;  %s882_s5 = sshll.u32 (!%p167_p10), %s189_s4, 7  ;;  %s947_s7 = sshll.u32 (!%p167_p10), %s1099_s15, 11 }
  0x11   : > { %v1028_v16 = vld [vmem:[%s1389_s1 + $0x38] sm:$0xff] (!%p167_p10)   ;;  %s1231_s6 = scalar_lea.vmem (!%p167_p10), [#allocation2], %s882_s5  ;;  %s1266_s11 = scalar_lea.hbm (!%p167_p10), %s1390_s2, %s947_s7 }
  0x12   : > { %s754_s8 = sshll.u32 (!%p167_p10), %s1231_s6, 4  ;;  %s1272_s18 = scalar_lea.sflag (!%p167_p10), [#allocation3], %s189_s4  ;;  %s1268_s8 = int_to_ptr.vmem [resolvable:$true] %s754_s8 }
  0x13   : > { %s1029_s19 = scalar_lea.vmem (!%p167_p10), %s1268_s8, 2048 }
  0x14   : > { %p1030_p12 = scmp.ne.s32.totalorder (!%p167_p10), %s1268_s8, %s1029_s19 }
  0x16   : > { %s1190_s26 = scalar_select %p204_p11, %s1099_s15, 1 }
  0x17   : > { %p1031_p13 = pnand %p1030_p12, %p1173_p4  ;;  %s1110_s15 = smov [#allocation2]  }
  0x18   : > { %s954_s27 = smul.u32 40, %s1190_s26  ;;  %s1033_s21 = sshll.u32 %s1110_s15, 4  ;;  %s1034_s21 = int_to_ptr.vmem [resolvable:$false] %s1033_s21 }
  0x19   : > { %p1032_p0 = pneg %p1031_p13  ;;  %s1035_s23 = scalar_lea.vmem %s1034_s21, 4096 }
  0x1a   : > { %s211_s30 = scalar_lea.vmem %s1388_s0, %s954_s27  ;;  %p1036_p1 = scmp.lt.s32.totalorder %s1268_s8, %s1034_s21 }
  0x1b   : > { %v1013_v1 = vld [vmem:[%s211_s30 + $0x4] ss:$8 sps:$4 sm:$0xff]   ;;  %v1015_v2 = vld [vmem:[%s211_s30] ss:$8 sps:$4 sm:$0xff]   ;;  %v1016_v3 = vld [vmem:[%s211_s30 + $0x14] ss:$8 sps:$4 sm:$0xff]   ;;  %p1037_p2 = scmp.lt.s32.totalorder %s1035_s23, %s1029_s19 }
  0x1c   : > { %342 = vmatprep.subr.bf16.mxu0 %v1013_v1  ;;  %948 = vmatprep.subr.bf16.mxu1 %v1013_v1  ;;  %v244_v4 = vld [vmem:[%s211_s30 + $0x20] sm:$0xff]  ;;  %v1018_v5 = vld [vmem:[%s211_s30 + $0x10] ss:$8 sps:$4 sm:$0xff]  }
  0x1d   : > { %343 = vmatpush1.bf16.msra.mxu0 %v1015_v2  ;;  %951 = vmatpush1.bf16.msra.mxu1 %v1015_v2  ;;  %v899_v6 = vcombine.high %v244_v4, %v244_v4  ;;  %v898_v7 = vcombine.low %v244_v4, %v244_v4  ;;  %p1038_p3 = por %p1037_p2, %p1036_p1 }
  0x1e   : > { %344 = vmatprep.subr.bf16.mxu0 %v1016_v3  ;;  %949 = vmatprep.subr.bf16.mxu1 %v1016_v3 }
  0x1f   : > { %v337_v8 = vsel %vm335_vm0, %v898_v7, 0  ;;  %p1039_p5 = pnand %p1038_p3, %p1032_p0 }
  0x21   : > { %345 = vmatpush1.bf16.msra.mxu0 %v1018_v5  ;;  %952 = vmatpush1.bf16.msra.mxu1 %v1018_v5 }
  0x22   : > { %900 = vmatprep.subr.msk.bf16.mxu0 %vm335_vm0, %v899_v6  ;;  %950 = vmatprep.subr.msk.bf16.mxu1 %vm335_vm0, %v899_v6 }
  0x25   : > { %347 = vmatpush1.bf16.msra.mxu0 %v337_v8  ;;  %953 = vmatpush1.bf16.msra.mxu1 %v337_v8 }
  0x28   : > { %901 = vmatmul.mubr.msk.bf16.vlgmr.msra.gmra.mrb[0].mxu0 %vm310_vm1, %v1021_v9  ;;  %905 = vmatmul.mubr.msk.bf16.vlgmr.msra.gmra.mrb[0].mxu1 %vm310_vm1, %v1022_v10 }
  0x29   : > { %384 = vmatprep.mubr.bf16.mxu0 %v1109_v0  ;;  %424 = vmatprep.mubr.bf16.mxu1 %v1109_v0 }
  0x30   : > { %902 = vmatmul.mubr.msk.bf16.gmra.mrb[4].mxu0 %vm310_vm1, %v1023_v11  ;;  %906 = vmatmul.mubr.msk.bf16.gmra.mrb[4].mxu1 %vm310_vm1, %v1024_v12 }
  0x31   : > { %394 = vmatprep.mubr.bf16.mxu0 %v1109_v0  ;;  %434 = vmatprep.mubr.bf16.mxu1 %v1109_v0 }
  0x38   : > { %903 = vmatmul.mubr.msk.bf16.gmra.mrb[8].mxu0 %vm310_vm1, %v1025_v13  ;;  %907 = vmatmul.mubr.msk.bf16.gmra.mrb[8].mxu1 %vm310_vm1, %v1026_v14 }
  0x39   : > { %404 = vmatprep.mubr.bf16.mxu0 %v1109_v0  ;;  %444 = vmatprep.mubr.bf16.mxu1 %v1109_v0 }
  0x40   : > { %904 = vmatmul.mubr.msk.bf16.gmra.mrb[12].mxu0 %vm310_vm1, %v1027_v15  ;;  %908 = vmatmul.mubr.msk.bf16.gmra.mrb[12].mxu1 %vm310_vm1, %v1028_v16 }
  0xfb   : > { %v376_v17 = vpop.f32.mrb[0].mxu0  ;;  %v416_v18 = vpop.f32.mrb[0].mxu1 }
  0xfc   : > { %v378_v19 = vpop.f32.mrb[1].mxu0  ;;  %v418_v20 = vpop.f32.mrb[1].mxu1  ;;  %v632_v21 = vmul.f32 %v376_v17, %v376_v17  ;;  %v648_v22 = vmul.f32 %v416_v18, %v416_v18 }
  0xfd   : > { %v931_v23 = vpack.c.bf16 %v378_v19, %v376_v17  ;;  %v939_v24 = vpack.c.bf16 %v418_v20, %v416_v18  ;;  %v380_v25 = vpop.f32.mrb[2].mxu0  ;;  %v420_v26 = vpop.f32.mrb[2].mxu1  ;;  %v567_v27 = vadd.f32 %v378_v19, %v376_v17  ;;  %v591_v28 = vadd.f32 %v418_v20, %v416_v18 }
  0xfe   : > { %v382_v29 = vpop.f32.mrb[3].mxu0  ;;  %v422_v30 = vpop.f32.mrb[3].mxu1  ;;  %v634_v31 = vmul.f32 %v380_v25, %v380_v25  ;;  %v650_v32 = vmul.f32 %v420_v26, %v420_v26  ;;  %v633_v33 = vmul.f32 %v378_v19, %v378_v19  ;;  %v649_v34 = vmul.f32 %v418_v20, %v418_v20 }
  0xff   : > { %551 = vst [vmem:[%s1231_s6] sm:$0xff] %v931_v23  ;;  %559 = vst [vmem:[%s1231_s6 + $0x40] sm:$0xff] %v939_v24  ;;  %v932_v35 = vpack.c.bf16 %v382_v29, %v380_v25  ;;  %v940_v36 = vpack.c.bf16 %v422_v30, %v420_v26  ;;  %568 = vadd.xlane.f32.xlu0 %v567_v27  ;;  %v594_v37 = vadd.f32 %v422_v30, %v420_v26 }
 0x100   : > { %v635_v38 = vmul.f32 %v382_v29, %v382_v29  ;;  %v570_v39 = vadd.f32 %v382_v29, %v380_v25  ;;  %v651_v40 = vmul.f32 %v422_v30, %v422_v30  ;;  %v664_v41 = vadd.f32 %v633_v33, %v632_v21 }
 0x101   : > { %v688_v42 = vadd.f32 %v649_v34, %v648_v22  ;;  %552 = vst [vmem:[%s1231_s6 + $0x8] sm:$0xff] %v932_v35  ;;  %560 = vst [vmem:[%s1231_s6 + $0x48] sm:$0xff] %v940_v36  ;;  %595 = vadd.xlane.f32.xlu1 %v594_v37 }
 0x102   : > { %v667_v43 = vadd.f32 %v635_v38, %v634_v31  ;;  %v691_v44 = vadd.f32 %v651_v40, %v650_v32 }
 0x103   : > { %592 = vadd.xlane.f32.xlu0 %v591_v28  ;;  %v386_v45 = vpop.f32.mrb[4].mxu0  ;;  %v426_v46 = vpop.f32.mrb[4].mxu1 }
 0x104   : > { %v388_v47 = vpop.f32.mrb[5].mxu0  ;;  %v428_v48 = vpop.f32.mrb[5].mxu1  ;;  %v636_v49 = vmul.f32 %v386_v45, %v386_v45  ;;  %v652_v50 = vmul.f32 %v426_v46, %v426_v46 }
 0x105   : > { %668 = vadd.xlane.f32.xlu1 %v667_v43  ;;  %v933_v51 = vpack.c.bf16 %v388_v47, %v386_v45  ;;  %v390_v52 = vpop.f32.mrb[6].mxu0  ;;  %v941_v53 = vpack.c.bf16 %v428_v48, %v426_v46  ;;  %v573_v54 = vadd.f32 %v388_v47, %v386_v45  ;;  %v430_v55 = vpop.f32.mrb[6].mxu1  ;;  %v597_v56 = vadd.f32 %v428_v48, %v426_v46 }
 0x106   : > { %v392_v57 = vpop.f32.mrb[7].mxu0  ;;  %v432_v58 = vpop.f32.mrb[7].mxu1  ;;  %v637_v59 = vmul.f32 %v388_v47, %v388_v47  ;;  %v638_v60 = vmul.f32 %v390_v52, %v390_v52  ;;  %v653_v61 = vmul.f32 %v428_v48, %v428_v48  ;;  %v654_v62 = vmul.f32 %v430_v55, %v430_v55 }
 0x107   : > { %571 = vadd.xlane.f32.xlu0 %v570_v39  ;;  %553 = vst [vmem:[%s1231_s6 + $0x10] sm:$0xff] %v933_v51  ;;  %v934_v63 = vpack.c.bf16 %v392_v57, %v390_v52  ;;  %561 = vst [vmem:[%s1231_s6 + $0x50] sm:$0xff] %v941_v53  ;;  %v942_v0 = vpack.c.bf16 %v432_v58, %v430_v55  ;;  %v576_v1 = vadd.f32 %v392_v57, %v390_v52 }
 0x108   : > { %v600_v2 = vadd.f32 %v432_v58, %v430_v55  ;;  %v1239_v3 = vadd.f32 %v637_v59, %v636_v49  ;;  %v639_v4 = vmul.f32 %v392_v57, %v392_v57  ;;  %v1241_v5 = vadd.f32 %v653_v61, %v652_v50 }
 0x109   : > { %v655_v6 = vmul.f32 %v432_v58, %v432_v58  ;;  %692 = vadd.xlane.f32.xlu1 %v691_v44  ;;  %554 = vst [vmem:[%s1231_s6 + $0x18] sm:$0xff] %v934_v63  ;;  %562 = vst [vmem:[%s1231_s6 + $0x58] sm:$0xff] %v942_v0 }
 0x10a   : > { %v1245_v7 = vadd.f32 %v639_v4, %v638_v60 }
 0x10b   : > { %v1247_v8 = vadd.f32 %v655_v6, %v654_v62  ;;  %665 = vadd.xlane.f32.xlu0 %v664_v41  ;;  %v396_v9 = vpop.f32.mrb[8].mxu0  ;;  %v436_v10 = vpop.f32.mrb[8].mxu1 }
 0x10c   : > { %v398_v11 = vpop.f32.mrb[9].mxu0  ;;  %v438_v12 = vpop.f32.mrb[9].mxu1  ;;  %v640_v13 = vmul.f32 %v396_v9, %v396_v9  ;;  %v656_v14 = vmul.f32 %v436_v10, %v436_v10 }
 0x10d   : > { %574 = vadd.xlane.f32.xlu1 %v573_v54  ;;  %v935_v15 = vpack.c.bf16 %v398_v11, %v396_v9  ;;  %v400_v16 = vpop.f32.mrb[10].mxu0  ;;  %v943_v17 = vpack.c.bf16 %v438_v12, %v436_v10  ;;  %v440_v18 = vpop.f32.mrb[10].mxu1  ;;  %v579_v19 = vadd.f32 %v398_v11, %v396_v9  ;;  %v603_v20 = vadd.f32 %v438_v12, %v436_v10 }
 0x10e   : > { %v402_v21 = vpop.f32.mrb[11].mxu0  ;;  %v442_v22 = vpop.f32.mrb[11].mxu1  ;;  %v641_v23 = vmul.f32 %v398_v11, %v398_v11  ;;  %v642_v24 = vmul.f32 %v400_v16, %v400_v16  ;;  %v657_v25 = vmul.f32 %v438_v12, %v438_v12  ;;  %v658_v26 = vmul.f32 %v440_v18, %v440_v18 }
 0x10f   : > { %689 = vadd.xlane.f32.xlu0 %v688_v42  ;;  %555 = vst [vmem:[%s1231_s6 + $0x20] sm:$0xff] %v935_v15  ;;  %v936_v27 = vpack.c.bf16 %v402_v21, %v400_v16  ;;  %563 = vst [vmem:[%s1231_s6 + $0x60] sm:$0xff] %v943_v17  ;;  %v944_v28 = vpack.c.bf16 %v442_v22, %v440_v18  ;;  %v582_v29 = vadd.f32 %v402_v21, %v400_v16 }
 0x110   : > { %v606_v30 = vadd.f32 %v442_v22, %v440_v18  ;;  %v676_v31 = vadd.f32 %v641_v23, %v640_v13  ;;  %v643_v32 = vmul.f32 %v402_v21, %v402_v21  ;;  %v700_v33 = vadd.f32 %v657_v25, %v656_v14 }
 0x111   : > { %v659_v34 = vmul.f32 %v442_v22, %v442_v22  ;;  %577 = vadd.xlane.f32.xlu1 %v576_v1  ;;  %556 = vst [vmem:[%s1231_s6 + $0x28] sm:$0xff] %v936_v27  ;;  %564 = vst [vmem:[%s1231_s6 + $0x68] sm:$0xff] %v944_v28 }
 0x112   : > { %v679_v35 = vadd.f32 %v643_v32, %v642_v24 }
 0x113   : > { %v703_v36 = vadd.f32 %v659_v34, %v658_v26  ;;  %598 = vadd.xlane.f32.xlu0 %v597_v56  ;;  %v406_v37 = vpop.f32.mrb[12].mxu0  ;;  %v446_v38 = vpop.f32.mrb[12].mxu1 }
 0x114   : > { %v408_v39 = vpop.f32.mrb[13].mxu0  ;;  %v448_v40 = vpop.f32.mrb[13].mxu1  ;;  %v644_v41 = vmul.f32 %v406_v37, %v406_v37  ;;  %v660_v42 = vmul.f32 %v446_v38, %v446_v38 }
 0x115   : > { %601 = vadd.xlane.f32.xlu1 %v600_v2  ;;  %v937_v43 = vpack.c.bf16 %v408_v39, %v406_v37  ;;  %v410_v44 = vpop.f32.mrb[14].mxu0  ;;  %v945_v45 = vpack.c.bf16 %v448_v40, %v446_v38  ;;  %v450_v46 = vpop.f32.mrb[14].mxu1  ;;  %v585_v47 = vadd.f32 %v408_v39, %v406_v37  ;;  %v609_v48 = vadd.f32 %v448_v40, %v446_v38 }
 0x116   : > { %v412_v49 = vpop.f32.mrb[15].mxu0  ;;  %v452_v50 = vpop.f32.mrb[15].mxu1  ;;  %v645_v51 = vmul.f32 %v408_v39, %v408_v39  ;;  %v646_v52 = vmul.f32 %v410_v44, %v410_v44  ;;  %v661_v53 = vmul.f32 %v448_v40, %v448_v40  ;;  %v662_v54 = vmul.f32 %v450_v46, %v450_v46 }
 0x117   : > { %671 = vadd.xlane.f32.xlu0 %v1239_v3  ;;  %557 = vst [vmem:[%s1231_s6 + $0x30] sm:$0xff] %v937_v43  ;;  %v938_v55 = vpack.c.bf16 %v412_v49, %v410_v44  ;;  %v647_v56 = vmul.f32 %v412_v49, %v412_v49  ;;  %565 = vst [vmem:[%s1231_s6 + $0x70] sm:$0xff] %v945_v45  ;;  %v946_v57 = vpack.c.bf16 %v452_v50, %v450_v46 }
 0x118   : > { %v663_v58 = vmul.f32 %v452_v50, %v452_v50  ;;  %v588_v59 = vadd.f32 %v412_v49, %v410_v44  ;;  %v612_v60 = vadd.f32 %v452_v50, %v450_v46  ;;  %v682_v61 = vadd.f32 %v645_v51, %v644_v41 }
 0x119   : > { %v706_v62 = vadd.f32 %v661_v53, %v660_v42  ;;  %674 = vadd.xlane.f32.xlu1 %v1245_v7  ;;  %558 = vst [vmem:[%s1231_s6 + $0x38] sm:$0xff] %v938_v55  ;;  %566 = vst [vmem:[%s1231_s6 + $0x78] sm:$0xff] %v946_v57  ;;  %v685_v63 = vadd.f32 %v647_v56, %v646_v52 }
 0x11a   : > { %v709_v0 = vadd.f32 %v663_v58, %v662_v54 }
 0x11b   : > { %695 = vadd.xlane.f32.xlu0 %v1241_v5 }
 0x11d   : > { %698 = vadd.xlane.f32.xlu1 %v1247_v8 }
 0x11f   : > { %580 = vadd.xlane.f32.xlu0 %v579_v19 }
 0x121   : > { %583 = vadd.xlane.f32.xlu1 %v582_v29 }
 0x123   : > { %604 = vadd.xlane.f32.xlu0 %v603_v20 }
 0x125   : > { %607 = vadd.xlane.f32.xlu1 %v606_v30 }
 0x127   : > { %677 = vadd.xlane.f32.xlu0 %v676_v31 }
 0x129   : > { %680 = vadd.xlane.f32.xlu1 %v679_v35 }
 0x12b   : > { %701 = vadd.xlane.f32.xlu0 %v700_v33 }
 0x12d   : > { %704 = vadd.xlane.f32.xlu1 %v703_v36 }
 0x12f   : > { %586 = vadd.xlane.f32.xlu0 %v585_v47 }
 0x131   : > { %589 = vadd.xlane.f32.xlu1 %v588_v59 }
 0x133   : > { %610 = vadd.xlane.f32.xlu0 %v609_v48 }
 0x135   : > { %613 = vadd.xlane.f32.xlu1 %v612_v60 }
 0x137   : > { %683 = vadd.xlane.f32.xlu0 %v682_v61 }
 0x139   : > { %686 = vadd.xlane.f32.xlu1 %v685_v63 }
 0x13b   : > { %707 = vadd.xlane.f32.xlu0 %v706_v62 }
 0x13d   : > { %710 = vadd.xlane.f32.xlu1 %v709_v0 }
 0x13e   : > { %1042 = shalt.err (!%p1039_p5)
}
 0x13f   : > { %s1043_s27 = scalar_lea.hbm %s1266_s11, 2048  ;;  %s1047_s30 = scalar_lea.hbm %s1390_s2, 4096 }
 0x140   : > { %p1044_p6 = scmp.ne.s32.totalorder %s1266_s11, %s1043_s27  ;;  %p1048_p10 = scmp.lt.u32.totalorder %s1266_s11, %s1390_s2 }
 0x141   : > { %p1049_p11 = scmp.lt.u32.totalorder %s1047_s30, %s1043_s27  ;;  %p1051_p13 = scmp.lt.u32.totalorder %s1043_s27, %s1266_s11 }
 0x142   : > { %p1045_p7 = pnand %p1044_p6, %p1173_p4 }
 0x143   : > { %p1050_p12 = por %p1049_p11, %p1048_p10 }
 0x144   : > { %p1046_p9 = pneg %p1045_p7 }
 0x145   : > { %p1052_p0 = por %p1051_p13, %p1050_p12 }
 0x147   : > { %p1053_p1 = pnand %p1052_p0, %p1046_p9 }
 0x149   : > { %1056 = shalt.err (!%p1053_p1)
}
 0x14a   : > { %s1111_s6 = smov 128   ;;  %s1112_s7 = smov 8   ;;  %vm615_vm2 = vcmask 7168   ;;  %vm712_vm3 = vcmask 15368  }
 0x14b   : > { %955 = dma.vmem_to_hbm [thread:$0]  (%p1173_p4), %s1268_s8, 2048, %s1266_s11, %s1272_s18, %s1111_s6, %s1111_s6, %s1112_s7  }
 0x14c   : > { %s930_s9 = sshll.u32 %s1190_s26, 7 }
 0x14d   : > { %s1300_s15 = scalar_lea.vmem %s1391_s3, %s930_s9 }
 0x18c   : > { %v569_v1 = vpop.xlane.xlu0 %568 }
 0x18d   : > { %616 = vst.msk [vmem:[%s1300_s15] sm:$0xff] %vm615_vm2, %v569_v1 }
 0x18e   : > { %v596_v2 = vpop.xlane.xlu1 %595 }
 0x18f   : > { %625 = vst.msk [vmem:[%s1300_s15 + $0x48] sm:$0xff] %vm615_vm2, %v596_v2 }
 0x190   : > { %v593_v3 = vpop.xlane.xlu0 %592 }
 0x191   : > { %624 = vst.msk [vmem:[%s1300_s15 + $0x40] sm:$0xff] %vm615_vm2, %v593_v3 }
 0x192   : > { %v669_v4 = vpop.xlane.xlu1 %668 }
 0x194   : > { %v572_v5 = vpop.xlane.xlu0 %571 }
 0x195   : > { %617 = vst.msk [vmem:[%s1300_s15 + $0x8] sm:$0xff] %vm615_vm2, %v572_v5 }
 0x196   : > { %714 = vst.msk [vmem:[%s1300_s15 + $0x8] sm:$0xff] %vm712_vm3, %v669_v4  ;;  %v693_v6 = vpop.xlane.xlu1 %692 }
 0x197   : > { %722 = vst.msk [vmem:[%s1300_s15 + $0x48] sm:$0xff] %vm712_vm3, %v693_v6 }
 0x198   : > { %v666_v7 = vpop.xlane.xlu0 %665 }
 0x199   : > { %713 = vst.msk [vmem:[%s1300_s15] sm:$0xff] %vm712_vm3, %v666_v7 }
 0x19a   : > { %v575_v8 = vpop.xlane.xlu1 %574 }
 0x19b   : > { %618 = vst.msk [vmem:[%s1300_s15 + $0x10] sm:$0xff] %vm615_vm2, %v575_v8 }
 0x19c   : > { %v690_v9 = vpop.xlane.xlu0 %689 }
 0x19d   : > { %721 = vst.msk [vmem:[%s1300_s15 + $0x40] sm:$0xff] %vm712_vm3, %v690_v9 }
 0x19e   : > { %v578_v10 = vpop.xlane.xlu1 %577 }
 0x19f   : > { %619 = vst.msk [vmem:[%s1300_s15 + $0x18] sm:$0xff] %vm615_vm2, %v578_v10 }
 0x1a0   : > { %v599_v11 = vpop.xlane.xlu0 %598 }
 0x1a1   : > { %626 = vst.msk [vmem:[%s1300_s15 + $0x50] sm:$0xff] %vm615_vm2, %v599_v11 }
 0x1a2   : > { %v602_v12 = vpop.xlane.xlu1 %601 }
 0x1a3   : > { %627 = vst.msk [vmem:[%s1300_s15 + $0x58] sm:$0xff] %vm615_vm2, %v602_v12 }
 0x1a4   : > { %v672_v13 = vpop.xlane.xlu0 %671 }
 0x1a5   : > { %715 = vst.msk [vmem:[%s1300_s15 + $0x10] sm:$0xff] %vm712_vm3, %v672_v13 }
 0x1a6   : > { %v675_v14 = vpop.xlane.xlu1 %674 }
 0x1a7   : > { %716 = vst.msk [vmem:[%s1300_s15 + $0x18] sm:$0xff] %vm712_vm3, %v675_v14 }
 0x1a8   : > { %v696_v15 = vpop.xlane.xlu0 %695 }
 0x1a9   : > { %723 = vst.msk [vmem:[%s1300_s15 + $0x50] sm:$0xff] %vm712_vm3, %v696_v15 }
 0x1aa   : > { %v699_v16 = vpop.xlane.xlu1 %698 }
 0x1ab   : > { %724 = vst.msk [vmem:[%s1300_s15 + $0x58] sm:$0xff] %vm712_vm3, %v699_v16 }
 0x1ac   : > { %v581_v17 = vpop.xlane.xlu0 %580 }
 0x1ad   : > { %620 = vst.msk [vmem:[%s1300_s15 + $0x20] sm:$0xff] %vm615_vm2, %v581_v17 }
 0x1ae   : > { %v584_v18 = vpop.xlane.xlu1 %583 }
 0x1af   : > { %621 = vst.msk [vmem:[%s1300_s15 + $0x28] sm:$0xff] %vm615_vm2, %v584_v18 }
 0x1b0   : > { %v605_v19 = vpop.xlane.xlu0 %604 }
 0x1b1   : > { %628 = vst.msk [vmem:[%s1300_s15 + $0x60] sm:$0xff] %vm615_vm2, %v605_v19 }
 0x1b2   : > { %v608_v20 = vpop.xlane.xlu1 %607 }
 0x1b3   : > { %629 = vst.msk [vmem:[%s1300_s15 + $0x68] sm:$0xff] %vm615_vm2, %v608_v20 }
 0x1b4   : > { %v678_v21 = vpop.xlane.xlu0 %677 }
 0x1b5   : > { %717 = vst.msk [vmem:[%s1300_s15 + $0x20] sm:$0xff] %vm712_vm3, %v678_v21 }
 0x1b6   : > { %v681_v22 = vpop.xlane.xlu1 %680 }
 0x1b7   : > { %718 = vst.msk [vmem:[%s1300_s15 + $0x28] sm:$0xff] %vm712_vm3, %v681_v22 }
 0x1b8   : > { %v702_v23 = vpop.xlane.xlu0 %701 }
 0x1b9   : > { %725 = vst.msk [vmem:[%s1300_s15 + $0x60] sm:$0xff] %vm712_vm3, %v702_v23 }
 0x1ba   : > { %v705_v24 = vpop.xlane.xlu1 %704 }
 0x1bb   : > { %726 = vst.msk [vmem:[%s1300_s15 + $0x68] sm:$0xff] %vm712_vm3, %v705_v24 }
 0x1bc   : > { %v587_v25 = vpop.xlane.xlu0 %586 }
 0x1bd   : > { %622 = vst.msk [vmem:[%s1300_s15 + $0x30] sm:$0xff] %vm615_vm2, %v587_v25 }
 0x1be   : > { %v590_v26 = vpop.xlane.xlu1 %589 }
 0x1bf   : > { %623 = vst.msk [vmem:[%s1300_s15 + $0x38] sm:$0xff] %vm615_vm2, %v590_v26 }
 0x1c0   : > { %v611_v27 = vpop.xlane.xlu0 %610 }
 0x1c1   : > { %630 = vst.msk [vmem:[%s1300_s15 + $0x70] sm:$0xff] %vm615_vm2, %v611_v27 }
 0x1c2   : > { %v614_v28 = vpop.xlane.xlu1 %613 }
 0x1c3   : > { %631 = vst.msk [vmem:[%s1300_s15 + $0x78] sm:$0xff] %vm615_vm2, %v614_v28 }
 0x1c4   : > { %v684_v29 = vpop.xlane.xlu0 %683 }
 0x1c5   : > { %719 = vst.msk [vmem:[%s1300_s15 + $0x30] sm:$0xff] %vm712_vm3, %v684_v29 }
 0x1c6   : > { %v687_v30 = vpop.xlane.xlu1 %686 }
 0x1c7   : > { %720 = vst.msk [vmem:[%s1300_s15 + $0x38] sm:$0xff] %vm712_vm3, %v687_v30 }
 0x1c8   : > { %v708_v31 = vpop.xlane.xlu0 %707 }
 0x1c9   : > { %727 = vst.msk [vmem:[%s1300_s15 + $0x70] sm:$0xff] %vm712_vm3, %v708_v31 }
 0x1ca   : > { %v711_v32 = vpop.xlane.xlu1 %710 }
 0x1cb   : > { %728 = vst.msk [vmem:[%s1300_s15 + $0x78] sm:$0xff] %vm712_vm3, %v711_v32 }
 0x1cc PF: > { %p961_p4 = scmp.ge.s32.totalorder %s1107_s17, 2  ;;  %s772_s22 = sand.u32 1, %s1087_s12  }
 0x1cd   : > { %s773_s26 = scalar_lea.sflag [#allocation3], %s772_s22 }
 0x1ce   : > { %p958_p2 = pnand %p961_p4, %p1180_p8 }
 0x1d0   : > { %1082 = dma.done.wait (!%p958_p2), %s773_s26, 2048  }
 0x1d1   : > { %1084 = vsyncadd (!%p958_p2), %s773_s26, 4294965248  ;;  %s17_s17 = sadd.s32 1, %s1107_s17   ;;  %s1394_s12 = smov %s1091_s13 }
 0x1d2   : > { %p14_p3 = scmp.ge.s32.totalorder %s17_s17, 4   ;;  %s1395_s13 = smov %s1095_s14 }
 0x1d3   : > { %s1396_s14 = smov %s1186_s25  ;;  %s1397_s15 = smov %s1103_s16 }
 0x1d4   : > { %s1398_s16 = smov %s1400_s20  ;;  %16 = sbr.rel (!%p14_p3) target bundleno = 4 (0x4), region = 75 }
 0x1db   :  { %790 = vsyncpa [#allocation3], 1 }
 0x1dc   :  { %792 = vsyncpa [#allocation3 + $0x1], 1 }

</bundles_post_ra>
